<compile_context>
chip_gen: v6e
topology: v6e:2x2x1
jax: 0.10.0
libtpu: 0.0.40
codegen_flags: <defaults>
</compile_context>

<pallas_src>
from functools import partial

import jax
import jax.numpy as jnp
from jax.experimental import pallas as pl
from jax.experimental.pallas import tpu as pltpu


def _round_up(x: int, m: int) -> int:
    return (x + m - 1) // m * m


def _gram_kernel(x_ref, o_ref, acc_ref, *, tn, bps, n_total, need_mask):
    # x_ref: [K, TN] block of the stacked logits; o_ref: [1, K, K] per-shard
    # partial Gram; acc_ref: [K, K] f32 accumulator (persists across the grid).
    n = pl.program_id(1)

    @pl.when(n == 0)
    def _init():
        acc_ref[...] = jnp.zeros_like(acc_ref)

    # Intended (unclamped) global column offset of this block.  The index_map
    # clamps the DMA to stay in bounds; dead / tail columns are masked here.
    start = (pl.program_id(0) * bps + n) * tn

    def _accumulate():
        x = x_ref[...]
        if need_mask:
            col = jax.lax.broadcasted_iota(jnp.int32, x.shape, 1) + start
            x = jnp.where(col < n_total, x, jnp.zeros_like(x))
        # Contract the last dim of both operands -> MXU, no transpose needed.
        acc_ref[...] += jax.lax.dot_general(
            x, x,
            dimension_numbers=(((1,), (1,)), ((), ())),
            preferred_element_type=jnp.float32,
        )

    if need_mask:
        pl.when(start < n_total)(_accumulate)
    else:
        _accumulate()

    @pl.when(n == pl.num_programs(1) - 1)
    def _finalize():
        o_ref[0] = acc_ref[...]


def pairwise_mse(stacked: jax.Array, *, target_block_bytes: int = 4 << 20,
                 num_shards: int = 2) -> jax.Array:
    """stacked: [K, N] -> [K, K] matrix of mean((x_i - x_j)**2) (diag = 0)."""
    k, n = stacked.shape
    itemsize = jnp.dtype(stacked.dtype).itemsize

    # Tile size along N: multiple of 128, a few MiB per buffer so the
    # double-buffered block fits v7x's smaller VMEM comfortably.
    tn = max(128, (target_block_bytes // max(1, k * itemsize)) // 128 * 128)
    tn = min(tn, _round_up(n, 128))

    num_blocks = pl.cdiv(n, tn)
    num_shards = max(1, min(num_shards, num_blocks))
    bps = pl.cdiv(num_blocks, num_shards)          # blocks per shard
    need_mask = (n % tn != 0) or (num_shards * bps != num_blocks)

    block_bytes = k * tn * itemsize
    vmem_limit = int(min(100 << 20, max(8 << 20, 2 * block_bytes + (4 << 20))))

    in_spec = pl.BlockSpec(
        (k, tn),
        # Clamp so the DMA never starts past the array; dead blocks are
        # skipped / masked inside the kernel.
        lambda c, nb: (0, jnp.minimum(c * bps + nb, num_blocks - 1)),
    )
    out_spec = pl.BlockSpec((1, k, k), lambda c, nb: (c, 0, 0))

    parts = pl.pallas_call(
        partial(_gram_kernel, tn=tn, bps=bps, n_total=n, need_mask=need_mask),
        out_shape=jax.ShapeDtypeStruct((num_shards, k, k), jnp.float32),
        grid=(num_shards, bps),
        in_specs=[in_spec],
        out_specs=out_spec,
        scratch_shapes=[pltpu.VMEM((k, k), jnp.float32)],
        compiler_params=pltpu.CompilerParams(
            dimension_semantics=("parallel", "arbitrary"),
            vmem_limit_bytes=vmem_limit,
        ),
    )(stacked)

    # O(K^2) epilogue in plain JAX: squared norms come from the Gram diagonal.
    g = jnp.sum(parts, axis=0)                       # [K, K] full Gram (f32)
    sq = jnp.diagonal(g)                             # [K]  |x_i|^2
    d = sq[:, None] + sq[None, :] - 2.0 * g          # squared L2 distances
    d = jnp.maximum(d, 0.0) * (1.0 / float(n))       # mean over N, clamp fp dust
    d = d * (1.0 - jnp.eye(k, dtype=d.dtype))        # exact-zero diagonal
    return d


class MSELogits:
    """JAX/Pallas port of the PyTorch MSELogits two-group knowledge distiller."""

    def __init__(self, single_direction: bool = False, intra: bool = True, exclude_self=None):
        self.single_direction = single_direction
        self.intra = intra
        if exclude_self is None:
            self.exclude_self = True if intra else False
        else:
            self.exclude_self = exclude_self

    @staticmethod
    def _wrap1d(out):
        if isinstance(out, (list, tuple)):
            return tuple(out)
        return (out,)

    @staticmethod
    def _loss_mt2vec(mat, weight=None, exclude_self=False):
        if mat is None:
            return None
        num_preachers = mat.shape[-1] - (1 if exclude_self else 0)
        if weight is None:
            return jnp.sum(mat, axis=-1) / num_preachers
        return jnp.sum(mat * weight, axis=-1) / num_preachers

    def __call__(self, out_s, out_t, weight_s=None, weight_t=None):
        out_s = self._wrap1d(out_s)
        out_t = self._wrap1d(out_t)
        num_s = len(out_s)

        # Keep native dtype (e.g. bf16) -> the kernel reads half the HBM bytes
        # and accumulates in f32 on the MXU.
        flat = [jnp.reshape(x, (-1,)) for x in (list(out_s) + list(out_t))]
        stacked = jnp.stack(flat, axis=0)            # [K, N]
        d = pairwise_mse(stacked)                    # [K, K] pairwise MSE (diag = 0)

        # TODO(synk): PyTorch mse_loss detaches the target asymmetrically; the
        # forward values match, but gradient flow differs in this port.
        d_st = d[:num_s, num_s:]                     # student vs teacher
        d_ts = d_st.T                                # MSE is symmetric (values)
        d_ss = d[:num_s, :num_s]                     # student vs student (diag 0)
        d_tt = d[num_s:, num_s:]                     # teacher vs teacher (diag 0)

        if self.intra:
            loss_s = jnp.concatenate([d_st, d_ss], axis=1)
            loss_t = None if self.single_direction else jnp.concatenate([d_ts, d_tt], axis=1)
        else:
            loss_s = d_st
            loss_t = None if self.single_direction else d_ts

        return (self._loss_mt2vec(loss_s, weight_s, self.exclude_self),
                self._loss_mt2vec(loss_t, weight_t, self.exclude_self))


def _reference(out_s, out_t, single_direction=False, intra=True):
    """Pure-JAX reference mirroring the PyTorch DirectionController code path."""
    def mse(a, b):
        return jnp.mean((a - b) ** 2)

    num_s, num_t = len(out_s), len(out_t)
    exclude_self = True if intra else False
    loss_s = jnp.zeros((num_s, num_t + (num_s if intra else 0)), jnp.float32)
    loss_t = jnp.zeros((num_t, num_s + (num_t if intra else 0)), jnp.float32)
    for i, ls in enumerate(out_s):
        for j, lt in enumerate(out_t):
            loss_s = loss_s.at[i, j].set(mse(ls, lt))
            loss_t = loss_t.at[j, i].set(mse(lt, ls))
    if intra:
        for i, ls in enumerate(out_s):
            for j, other in enumerate(out_s):
                if i != j:
                    loss_s = loss_s.at[i, num_t + j].set(mse(ls, other))
        for i, lt in enumerate(out_t):
            for j, other in enumerate(out_t):
                if i != j:
                    loss_t = loss_t.at[i, num_s + j].set(mse(lt, other))
    den_s = loss_s.shape[-1] - (1 if exclude_self else 0)
    den_t = loss_t.shape[-1] - (1 if exclude_self else 0)
    return loss_s.sum(-1) / den_s, loss_t.sum(-1) / den_t


if __name__ == "__main__":
    key = jax.random.PRNGKey(0)
    k0, k1, k2, k3 = jax.random.split(key, 4)
    B, C = 2, 32  # logits: [batch, num_classes]
    out_s = [jax.random.normal(k0, (B, C), jnp.float32),
             jax.random.normal(k1, (B, C), jnp.float32)]
    out_t = [jax.random.normal(k2, (B, C), jnp.float32),
             jax.random.normal(k3, (B, C), jnp.float32)]

    kd = MSELogits(single_direction=False, intra=True)  # module defaults
    loss_s_vec, loss_t_vec = kd(out_s, out_t)
    jax.block_until_ready((loss_s_vec, loss_t_vec))

    ref_s, ref_t = _reference(out_s, out_t)
    assert loss_s_vec.shape == (len(out_s),) and loss_t_vec.shape == (len(out_t),)
    assert jnp.allclose(loss_s_vec, ref_s, rtol=1e-4, atol=1e-5), (loss_s_vec, ref_s)
    assert jnp.allclose(loss_t_vec, ref_t, rtol=1e-4, atol=1e-5), (loss_t_vec, ref_t)
    print("KERNEL_OK")
</pallas_src>

<mosaic_0001>
module attributes {stable_mosaic.version = 11 : i64} {
  func.func @_gram_kernel(%arg0: i32, %arg1: i32, %arg2: memref<4x128xf32, #tpu.memory_space<vmem>>, %arg3: memref<1x4x4xf32, #tpu.memory_space<vmem>>, %arg4: memref<4x4xf32, #tpu.memory_space<vmem>>) attributes {dimension_semantics = [#tpu.dimension_semantics<parallel>, #tpu.dimension_semantics<arbitrary>], iteration_bounds = array<i64: 1, 1>, scalar_prefetch = 0 : i64, scratch_operands = 1 : i64, tpu.core_type = #tpu.core_type<tc>, window_params = [{transform_indices = @transform_0, window_bounds = array<i64: 4, 128>}, {transform_indices = @transform_1, window_bounds = array<i64: 1, 4, 4>}]} {
    %c0_i32 = arith.constant 0 : i32
    %0 = arith.cmpi eq, %arg1, %c0_i32 : i32
    %1 = arith.extui %0 : i1 to i32
    %c0_i32_0 = arith.constant 0 : i32
    %2 = arith.cmpi ne, %1, %c0_i32_0 : i32
    scf.if %2 {
      %cst = arith.constant 0.000000e+00 : f32
      %12 = vector.broadcast %cst : f32 to vector<4x4xf32>
      %c0 = arith.constant 0 : index
      %c0_4 = arith.constant 0 : index
      %13 = vector.load %arg4[%c0, %c0_4] : memref<4x4xf32, #tpu.memory_space<vmem>>, vector<4x4xf32>
      tpu.vector_store %arg4[%c0, %c0_4], %12 {strides = array<i32>} : memref<4x4xf32, #tpu.memory_space<vmem>>, vector<4x4xf32>,
    } else {
    }
    %c1_i32 = arith.constant 1 : i32
    %3 = arith.muli %arg0, %c1_i32 : i32
    %4 = arith.addi %3, %arg1 : i32
    %c128_i32 = arith.constant 128 : i32
    %5 = arith.muli %4, %c128_i32 : i32
    %c64_i32 = arith.constant 64 : i32
    %6 = arith.cmpi slt, %5, %c64_i32 : i32
    %7 = arith.extui %6 : i1 to i32
    %c0_i32_1 = arith.constant 0 : i32
    %8 = arith.cmpi ne, %7, %c0_i32_1 : i32
    scf.if %8 {
      %c0 = arith.constant 0 : index
      %c0_4 = arith.constant 0 : index
      %12 = vector.load %arg2[%c0, %c0_4] : memref<4x128xf32, #tpu.memory_space<vmem>>, vector<4x128xf32>
      %13 = tpu.iota {dimensions = array<i32: 1>} : vector<4x128xi32>
      %14 = vector.broadcast %5 : i32 to vector<4x128xi32>
      %15 = arith.addi %13, %14 : vector<4x128xi32>
      %c64_i32_5 = arith.constant 64 : i32
      %16 = vector.broadcast %c64_i32_5 : i32 to vector<4x128xi32>
      %17 = arith.cmpi slt, %15, %16 : vector<4x128xi32>
      %cst = arith.constant 0.000000e+00 : f32
      %18 = vector.broadcast %cst : f32 to vector<4x128xf32>
      %19 = arith.select %17, %12, %18 : vector<4x128xi1>, vector<4x128xf32>
      %c0_6 = arith.constant 0 : index
      %c0_7 = arith.constant 0 : index
      %20 = vector.load %arg4[%c0_6, %c0_7] : memref<4x4xf32, #tpu.memory_space<vmem>>, vector<4x4xf32>
      %cst_8 = arith.constant dense<0.000000e+00> : vector<4x4xf32>
      %21 = tpu.matmul %19, %19, %cst_8 {dimension_numbers = #tpu.dot_dimension_numbers<[1], [1], [0], [0], [0, 0, 1, 0], [], []>} : vector<4x128xf32>, vector<4x128xf32>, vector<4x4xf32> -> vector<4x4xf32>
      %22 = arith.addf %20, %21 : vector<4x4xf32>
      %c0_9 = arith.constant 0 : index
      %c0_10 = arith.constant 0 : index
      %23 = vector.load %arg4[%c0_9, %c0_10] : memref<4x4xf32, #tpu.memory_space<vmem>>, vector<4x4xf32>
      tpu.vector_store %arg4[%c0_9, %c0_10], %22 {strides = array<i32>} : memref<4x4xf32, #tpu.memory_space<vmem>>, vector<4x4xf32>,
    } else {
    }
    %c0_i32_2 = arith.constant 0 : i32
    %9 = arith.cmpi eq, %arg1, %c0_i32_2 : i32
    %10 = arith.extui %9 : i1 to i32
    %c0_i32_3 = arith.constant 0 : i32
    %11 = arith.cmpi ne, %10, %c0_i32_3 : i32
    scf.if %11 {
      %c0 = arith.constant 0 : index
      %c0_4 = arith.constant 0 : index
      %12 = vector.load %arg4[%c0, %c0_4] : memref<4x4xf32, #tpu.memory_space<vmem>>, vector<4x4xf32>
      %c0_5 = arith.constant 0 : index
      %c0_6 = arith.constant 0 : index
      %c0_7 = arith.constant 0 : index
      %13 = vector.load %arg3[%c0_5, %c0_6, %c0_7] : memref<1x4x4xf32, #tpu.memory_space<vmem>>, vector<1x4x4xf32>
      %14 = vector.shape_cast %13 : vector<1x4x4xf32> to vector<4x4xf32>
      %15 = vector.shape_cast %12 : vector<4x4xf32> to vector<1x4x4xf32>
      tpu.vector_store %arg3[%c0_5, %c0_6, %c0_7], %15 {strides = array<i32>} : memref<1x4x4xf32, #tpu.memory_space<vmem>>, vector<1x4x4xf32>,
    } else {
    }
    return
  }
  func.func @transform_0(%arg0: i32, %arg1: i32) -> (i32, i32) {
    %c1_i32 = arith.constant 1 : i32
    %0 = arith.muli %arg0, %c1_i32 : i32
    %1 = arith.addi %0, %arg1 : i32
    %c0_i32 = arith.constant 0 : i32
    %2 = arith.minsi %1, %c0_i32 : i32
    %c0_i32_0 = arith.constant 0 : i32
    %c0_i32_1 = arith.constant 0 : i32
    return %c0_i32_0, %2 : i32, i32
  }
  func.func @transform_1(%arg0: i32, %arg1: i32) -> (i32, i32, i32) {
    %c0_i32 = arith.constant 0 : i32
    %c0_i32_0 = arith.constant 0 : i32
    %c0_i32_1 = arith.constant 0 : i32
    return %arg0, %c0_i32, %c0_i32_0 : i32, i32, i32
  }
}

</mosaic_0001>

<bundles_post_ra>
// kernel: tpu_custom_call.1
= control target key start
LH: loop header
LB: loop body
LE: loop exit
PB: predicated region body
PF: predicated region fallthrough
CT: control target
= control target key end

     0   :  { %6 = vsyncpa [#allocation4], 0  ;;  %s225_s0 = inlined_call_operand.hbm [shape: f32[4,64], index: 0, kind: input, shape index: {}]   ;;  %s226_s1 = inlined_call_operand.hbm [shape: f32[1,4,4], index: 1, kind: output, shape index: {}]  }
   0x1   :  { %7 = vsyncpa [#allocation5], 0  ;;  %s202_s6 = smov [#allocation3]  }
   0x2   :  { %s19_s7 = sshll.u32 %s202_s6, 4  ;;  %s20_s7 = int_to_ptr.vmem [resolvable:$true] %s19_s7 }
   0x3   :  { %s166_s8 = scalar_lea.vmem %s20_s7, 64  ;;  %p171_p1 = scmp.lt.s32.totalorder %s20_s7, %s20_s7 }
   0x4   :  { %p167_p0 = scmp.ne.s32.totalorder %s20_s7, %s166_s8  ;;  %p172_p2 = scmp.lt.s32.totalorder %s166_s8, %s166_s8 }
   0x6   :  { %p173_p3 = por %p172_p2, %p171_p1 }
   0x8   :  { %p174_p4 = pnand %p173_p3, %p167_p0 }
   0xa   :  { %177 = shalt.err (!%p174_p4)
}
   0xb   :  { %22 = dma.hbm_to_vmem [thread:$0]  %s225_s0, 64, %s20_s7, [#allocation4]  }
   0xc   :  { %198 = dma.done.wait [#allocation4], 64  }
   0xd   :  { %199 = vsyncadd [#allocation4], 4294967232  ;;  %vm33_vm0 = vcmask 27648   ;;  %v42_v0 = vlaneseq  ;;  %v203_v1 = vmov 0.0   ;;  %vm204_vm1 = vmmov 0   ;;  %s205_s0 = smov [#allocation6]  }
   0xe   :  { %34 = vst.msk [vmem:[#allocation2] sm:$0xf] %vm33_vm0, %v203_v1  ;;  %149 = vmatprep.subr.mxu0 %v203_v1  ;;  %151 = vmatprep.mubr.msk.f32.mxu0 %vm204_vm1, %v203_v1  ;;  %v41_v3 = vld [vmem:[#allocation3] sm:$0xf]  ;;  %s134_s11 = sshll.u32 %s205_s0, 4  ;;  %s135_s11 = int_to_ptr.vmem [resolvable:$true] %s134_s11 }
   0xf   :  { %v43_v2 = vand.u32 127, %v42_v0  ;;  %s178_s12 = scalar_lea.vmem %s135_s11, 64  ;;  %p183_p6 = scmp.lt.s32.totalorder %s135_s11, %s135_s11 }
  0x10   :  { %p179_p5 = scmp.ne.s32.totalorder %s135_s11, %s178_s12  ;;  %p184_p7 = scmp.lt.s32.totalorder %s178_s12, %s178_s12 }
  0x11   :  { %vm46_vm2 = vcmp.lt.s32.totalorder %v43_v2, 64 }
  0x12   :  { %150 = vmatpush3.xpose.msk.msra.mxu0 %vm46_vm2, %v41_v3  ;;  %p185_p8 = por %p184_p7, %p183_p6 }
  0x14   :  { %p186_p9 = pnand %p185_p8, %p179_p5 }
  0x15   :  { %152 = vmatmul.mubr.msk.f32.vlgmr.msra.gmra.mxu0 %vm46_vm2, %v41_v3  ;;  %v48_v4 = vld [vmem:[#allocation2] sm:$0xf] }
  0xd5   :  { %v115_v5 = vpop.f32.mrf.mxu0 }
  0xd6   :  { %v119_v6 = vadd.f32 %v115_v5, %v48_v4 }
  0xd7   :  { %v153_v7 = vpop.f32.mrf.mxu0 }
  0xd8   :  { %121 = vst.msk [vmem:[#allocation2] sm:$0xf] %vm33_vm0, %v119_v6 }
  0xdf   :  { %v125_v8 = vld [vmem:[#allocation2] sm:$0xf] }
  0xe0   :  { %127 = vst.msk [vmem:[#allocation6] sm:$0xf] %vm33_vm0, %v125_v8 }
  0xe1   :  { %189 = shalt.err (!%p186_p9)
}
  0xe2   :  { %137 = dma.vmem_to_hbm [thread:$0]  %s135_s11, 64, %s226_s1, [#allocation5]  }
  0xe3   :  { %200 = dma.done.wait [#allocation5], 64  }
  0xe4   :  { %201 = vsyncadd [#allocation5], 4294967232 }
  0xe5   :  { %141 = vsyncpa [#allocation4], 1 }
  0xe6   :  { %142 = vsyncpa [#allocation5], 1 }

</bundles_post_ra>
